<compile_context>
chip_gen: v7x
topology: tpu7x:2x2x1
jax: 0.10.0
libtpu: 0.0.40
codegen_flags: <defaults>
</compile_context>

<pallas_src>
import functools

import jax
import jax.numpy as jnp
from jax import lax
from jax.experimental import pallas as pl
from jax.experimental.pallas import tpu as pltpu


_LANE = 128
_HEADROOM_BYTES = 4 << 20   # compiler scratch / slack inside the VMEM limit


def _cdiv(a, b):
    return -(-a // b)


def _round_up(a, b):
    return _cdiv(a, b) * b


def _vmem_capacity_bytes():
    """Physical VMEM of the attached chip (conservative fallback = v7x 64 MiB)."""
    try:
        info = pltpu.get_tpu_info()
        cap = getattr(info, "vmem_capacity_bytes", None)
        if cap:
            return int(cap)
    except Exception:
        pass
    return 64 << 20


def _plan_tk(m, n, itemsize, resident_bytes):
    """Pick the K (spatial) tile width and the scoped-VMEM limit.

    The tile is sized so that the two double-buffered (m, tk) input tiles plus
    the resident f32 accumulator/target blocks fit the chip's VMEM with
    headroom.  tk is a multiple of 128 lanes unless the whole spatial axis fits
    in one tile (then tk == n, which is always a legal block dim).
    """
    cap = _vmem_capacity_bytes()
    vmem_limit = int(cap * 3 // 4)          # 48 MiB on v7x, 96 MiB on v5e/v6e
    budget = vmem_limit - resident_bytes - _HEADROOM_BYTES
    bytes_per_lane_col = 2 * m * itemsize   # one lane column, double buffered
    max_lanes = max(_LANE, budget // max(bytes_per_lane_col, 1))
    if n <= max_lanes:
        return n, 1, vmem_limit             # single full-width tile, no tail
    tk = (max_lanes // _LANE) * _LANE
    kt = _cdiv(n, tk)
    tk = _round_up(_cdiv(n, kt), _LANE)     # rebalance -> minimal ragged tail
    kt = _cdiv(n, tk)
    return tk, kt, vmem_limit


def _masked_tile(f_ref, k, tk, n, mask_tail):
    """Load the current (m, tk) feature tile; zero columns past the true n."""
    f = f_ref[...]
    if mask_tail:   # static (trace-time) condition
        col = k * tk + lax.broadcasted_iota(jnp.int32, f.shape, 1)
        f = jnp.where(col < n, f, jnp.zeros_like(f))
    return f


# ---------------------------------------------------------------------------
# Kernel 1: gram matrix (used once, for the target feature in __init__).
# Accumulates F @ F.T directly in the resident f32 output block.
# ---------------------------------------------------------------------------
def _gram_kernel(f_ref, g_ref, *, n, tk, norm, mask_tail):
    k = pl.program_id(0)

    @pl.when(k == 0)
    def _():
        g_ref[...] = jnp.zeros_like(g_ref)

    f = _masked_tile(f_ref, k, tk, n, mask_tail)
    # F @ F.T without materializing the transpose (contract the lane axis).
    g_ref[...] += lax.dot_general(
        f, f,
        dimension_numbers=(((1,), (1,)), ((), ())),
        preferred_element_type=jnp.float32,
    )

    @pl.when(k == pl.num_programs(0) - 1)
    def _():
        g_ref[...] = g_ref[...] * norm


def gram_matrix(x, compute_dtype=None):
    """x: (B, C, H, W) -> (B*C, B*C) float32 gram, normalized by B*C*H*W."""
    b, c, h, w = x.shape
    m, n = b * c, h * w
    feats = x.reshape(m, n)
    if compute_dtype is not None:
        feats = feats.astype(compute_dtype)
    itemsize = jnp.dtype(feats.dtype).itemsize
    # Resident: double-buffered (m, m) f32 output block.
    tk, kt, vmem_limit = _plan_tk(m, n, itemsize, resident_bytes=2 * m * m * 4)
    norm = 1.0 / float(b * c * h * w)
    mask_tail = (kt * tk != n)

    return pl.pallas_call(
        functools.partial(_gram_kernel, n=n, tk=tk, norm=norm,
                          mask_tail=mask_tail),
        out_shape=jax.ShapeDtypeStruct((m, m), jnp.float32),
        grid_spec=pltpu.PrefetchScalarGridSpec(
            num_scalar_prefetch=0,
            grid=(kt,),
            in_specs=[pl.BlockSpec((m, tk), lambda k: (0, k))],
            out_specs=pl.BlockSpec((m, m), lambda k: (0, 0)),
        ),
        compiler_params=pltpu.CompilerParams(
            dimension_semantics=("arbitrary",),
            vmem_limit_bytes=vmem_limit,
        ),
    )(feats)


# ---------------------------------------------------------------------------
# Kernel 2 (the per-forward hot path): fused gram + normalization + MSE.
# The f32 gram lives only in a VMEM scratch accumulator; the target stays
# resident; the scalar loss is the only HBM output.
# ---------------------------------------------------------------------------
def _gram_mse_kernel(f_ref, t_ref, loss_ref, acc_ref, *,
                     n, tk, norm, inv_count, mask_tail):
    k = pl.program_id(0)

    @pl.when(k == 0)
    def _():
        acc_ref[...] = jnp.zeros_like(acc_ref)

    f = _masked_tile(f_ref, k, tk, n, mask_tail)
    acc_ref[...] += lax.dot_general(
        f, f,
        dimension_numbers=(((1,), (1,)), ((), ())),
        preferred_element_type=jnp.float32,
    )

    @pl.when(k == pl.num_programs(0) - 1)
    def _():
        d = acc_ref[...] * norm - t_ref[...]
        loss_ref[...] = (jnp.sum(d * d) * inv_count).reshape(1, 1)


def gram_mse_loss(x, target_gram, compute_dtype=None):
    """mse(gram(x), target_gram) as a single fused Pallas pass -> f32 scalar."""
    b, c, h, w = x.shape
    m, n = b * c, h * w
    if target_gram.shape != (m, m):
        raise ValueError("target gram shape must match the input's B*C")
    feats = x.reshape(m, n)
    if compute_dtype is not None:
        feats = feats.astype(compute_dtype)
    itemsize = jnp.dtype(feats.dtype).itemsize
    # Resident: double-buffered (m, m) f32 target + (m, m) f32 scratch acc.
    tk, kt, vmem_limit = _plan_tk(m, n, itemsize, resident_bytes=3 * m * m * 4)
    # Normalize by the INPUT's own B*C*H*W (matches PyTorch's gram_matrix).
    norm = 1.0 / float(b * c * h * w)
    mask_tail = (kt * tk != n)

    out = pl.pallas_call(
        functools.partial(_gram_mse_kernel, n=n, tk=tk, norm=norm,
                          inv_count=1.0 / float(m * m), mask_tail=mask_tail),
        out_shape=jax.ShapeDtypeStruct((1, 1), jnp.float32),
        grid_spec=pltpu.PrefetchScalarGridSpec(
            num_scalar_prefetch=0,
            grid=(kt,),
            in_specs=[pl.BlockSpec((m, tk), lambda k: (0, k)),
                      pl.BlockSpec((m, m), lambda k: (0, 0))],
            out_specs=pl.BlockSpec((1, 1), lambda k: (0, 0)),
            scratch_shapes=[pltpu.VMEM((m, m), jnp.float32)],
        ),
        compiler_params=pltpu.CompilerParams(
            dimension_semantics=("arbitrary",),
            vmem_limit_bytes=vmem_limit,
        ),
    )(feats, target_gram)
    return out[0, 0]


# ---------------------------------------------------------------------------
# Module-equivalent wrapper.
# ---------------------------------------------------------------------------
class StyleLoss:
    """Pallas port of the PyTorch StyleLoss module (no learnable params).

    compute_dtype: optionally cast features (e.g. jnp.bfloat16) before the
    gram matmul to halve HBM read bytes; accumulation stays f32.  Default None
    keeps the input dtype (bit-comparable to the f32 reference).
    """

    def __init__(self, target_feature, compute_dtype=None):
        self._compute_dtype = compute_dtype
        self.target = lax.stop_gradient(
            gram_matrix(target_feature, compute_dtype))      # (B*C, B*C) f32
        # F.mse_loss(target, target) is exactly zero.
        self.loss = jnp.zeros((), jnp.float32)

    def __call__(self, x):
        self.loss = gram_mse_loss(x, self.target, self._compute_dtype)
        return x  # forward returns the input unchanged


if __name__ == "__main__":
    key = jax.random.PRNGKey(0)
    k_t, k_x = jax.random.split(key)

    B, C, H, W = 2, 4, 16, 16
    target_feature = jax.random.normal(k_t, (B, C, H, W), dtype=jnp.float32)
    x = jax.random.normal(k_x, (B, C, H, W), dtype=jnp.float32)

    module = StyleLoss(target_feature)
    out = module(x)
    loss = module.loss

    jax.block_until_ready(out)
    jax.block_until_ready(loss)
    jax.block_until_ready(module.target)

    # Pure-JAX reference check of the gram/MSE semantics.
    def ref_gram(a):
        f = a.reshape(B * C, H * W)
        return (f @ f.T) / (B * C * H * W)

    ref_loss = jnp.mean((ref_gram(x) - ref_gram(target_feature)) ** 2)
    assert jnp.allclose(out, x), "forward must pass the input through unchanged"
    assert jnp.allclose(module.target, ref_gram(target_feature),
                        rtol=1e-5, atol=1e-5)
    assert jnp.allclose(loss, ref_loss, rtol=1e-5, atol=1e-5), (loss, ref_loss)

    print("KERNEL_OK")
</pallas_src>

<mosaic_0001>
module attributes {stable_mosaic.version = 11 : i64} {
  func.func @_gram_kernel(%arg0: i32, %arg1: memref<8x256xf32, #tpu.memory_space<vmem>>, %arg2: memref<8x8xf32, #tpu.memory_space<vmem>>) attributes {dimension_semantics = [#tpu.dimension_semantics<arbitrary>], iteration_bounds = array<i64: 1>, scalar_prefetch = 0 : i64, scratch_operands = 0 : i64, tpu.core_type = #tpu.core_type<tc>, window_params = [{transform_indices = @transform_0, window_bounds = array<i64: 8, 256>}, {pipeline_mode = #tpu.pipeline_mode<synchronous>, transform_indices = @transform_1, window_bounds = array<i64: 8, 8>}]} {
    %c0_i32 = arith.constant 0 : i32
    %0 = arith.cmpi eq, %arg0, %c0_i32 : i32
    %1 = arith.extui %0 : i1 to i32
    %c0_i32_0 = arith.constant 0 : i32
    %2 = arith.cmpi ne, %1, %c0_i32_0 : i32
    scf.if %2 {
      %cst_8 = arith.constant 0.000000e+00 : f32
      %11 = vector.broadcast %cst_8 : f32 to vector<8x8xf32>
      %c0_9 = arith.constant 0 : index
      %c0_10 = arith.constant 0 : index
      %12 = vector.load %arg2[%c0_9, %c0_10] : memref<8x8xf32, #tpu.memory_space<vmem>>, vector<8x8xf32>
      tpu.vector_store %arg2[%c0_9, %c0_10], %11 {strides = array<i32>} : memref<8x8xf32, #tpu.memory_space<vmem>>, vector<8x8xf32>,
    } else {
    }
    %c0 = arith.constant 0 : index
    %c0_1 = arith.constant 0 : index
    %3 = vector.load %arg1[%c0, %c0_1] : memref<8x256xf32, #tpu.memory_space<vmem>>, vector<8x256xf32>
    %c0_2 = arith.constant 0 : index
    %c0_3 = arith.constant 0 : index
    %4 = vector.load %arg2[%c0_2, %c0_3] : memref<8x8xf32, #tpu.memory_space<vmem>>, vector<8x8xf32>
    %cst = arith.constant dense<0.000000e+00> : vector<8x8xf32>
    %5 = tpu.matmul %3, %3, %cst {dimension_numbers = #tpu.dot_dimension_numbers<[1], [1], [0], [0], [0, 0, 1, 0], [], []>} : vector<8x256xf32>, vector<8x256xf32>, vector<8x8xf32> -> vector<8x8xf32>
    %6 = arith.addf %4, %5 : vector<8x8xf32>
    %c0_4 = arith.constant 0 : index
    %c0_5 = arith.constant 0 : index
    %7 = vector.load %arg2[%c0_4, %c0_5] : memref<8x8xf32, #tpu.memory_space<vmem>>, vector<8x8xf32>
    tpu.vector_store %arg2[%c0_4, %c0_5], %6 {strides = array<i32>} : memref<8x8xf32, #tpu.memory_space<vmem>>, vector<8x8xf32>,
    %c0_i32_6 = arith.constant 0 : i32
    %8 = arith.cmpi eq, %arg0, %c0_i32_6 : i32
    %9 = arith.extui %8 : i1 to i32
    %c0_i32_7 = arith.constant 0 : i32
    %10 = arith.cmpi ne, %9, %c0_i32_7 : i32
    scf.if %10 {
      %c0_8 = arith.constant 0 : index
      %c0_9 = arith.constant 0 : index
      %11 = vector.load %arg2[%c0_8, %c0_9] : memref<8x8xf32, #tpu.memory_space<vmem>>, vector<8x8xf32>
      %cst_10 = arith.constant 4.8828125E-4 : f32
      %12 = vector.broadcast %cst_10 : f32 to vector<8x8xf32>
      %13 = arith.mulf %11, %12 : vector<8x8xf32>
      %c0_11 = arith.constant 0 : index
      %c0_12 = arith.constant 0 : index
      %14 = vector.load %arg2[%c0_11, %c0_12] : memref<8x8xf32, #tpu.memory_space<vmem>>, vector<8x8xf32>
      tpu.vector_store %arg2[%c0_11, %c0_12], %13 {strides = array<i32>} : memref<8x8xf32, #tpu.memory_space<vmem>>, vector<8x8xf32>,
    } else {
    }
    return
  }
  func.func @transform_0(%arg0: i32) -> (i32, i32) {
    %c0_i32 = arith.constant 0 : i32
    %c0_i32_0 = arith.constant 0 : i32
    return %c0_i32, %arg0 : i32, i32
  }
  func.func @transform_1(%arg0: i32) -> (i32, i32) {
    %c0_i32 = arith.constant 0 : i32
    %c0_i32_0 = arith.constant 0 : i32
    %c0_i32_1 = arith.constant 0 : i32
    return %c0_i32, %c0_i32_0 : i32, i32
  }
}

</mosaic_0001>

<bundles_post_ra>
// kernel: tpu_custom_call.1
= control target key start
LH: loop header
LB: loop body
LE: loop exit
PB: predicated region body
PF: predicated region fallthrough
CT: control target
= control target key end

     0   :  { %6 = vsyncpa [#allocation3], 0  ;;  %s215_s0 = inlined_call_operand.hbm [shape: f32[8,256], index: 0, kind: input, shape index: {}]   ;;  %s216_s1 = inlined_call_operand.hbm [shape: f32[8,8], index: 1, kind: output, shape index: {}]  }
   0x1   :  { %7 = vsyncpa [#allocation4], 0  ;;  %s175_s6 = smov [#allocation2]   ;;  %s127_s10 = scalar_lea.hbm %s215_s0, 256 }
   0x2   :  { %s14_s7 = sshll.u32 %s175_s6, 4  ;;  %p128_p0 = scmp.ne.s32.totalorder %s215_s0, %s127_s10  ;;  %s15_s7 = int_to_ptr.vmem [resolvable:$true] %s14_s7 }
   0x3   :  { %p131_p1 = scmp.lt.u32.totalorder %s127_s10, %s215_s0 }
   0x5   :  { %p133_p2 = pnand %p131_p1, %p128_p0 }
   0x7   :  { %136 = shalt.err (!%p133_p2)
}
   0x8   :  { %s137_s15 = scalar_lea.vmem %s15_s7, 256  ;;  %p142_p4 = scmp.lt.s32.totalorder %s15_s7, %s15_s7 }
   0x9   :  { %p138_p3 = scmp.ne.s32.totalorder %s15_s7, %s137_s15  ;;  %p143_p5 = scmp.lt.s32.totalorder %s137_s15, %s137_s15 }
   0xb   :  { %p144_p6 = por %p143_p5, %p142_p4 }
   0xd   :  { %p145_p7 = pnand %p144_p6, %p138_p3 }
   0xf   :  { %148 = shalt.err (!%p145_p7)
}
  0x10   :  { %17 = dma.hbm_to_vmem [thread:$0]  %s215_s0, 256, %s15_s7, [#allocation3]  }
  0x11   :  { %171 = dma.done.wait [#allocation3], 256  }
  0x12   :  { %172 = vsyncadd [#allocation3], 4294967040  ;;  %vm25_vm0 = vcmask 64512   ;;  %v176_v0 = vmov 0.0   ;;  %v28_v1 = vld [vmem:[#allocation2 + $0x8] sm:$0xff]  ;;  %v27_v2 = vld [vmem:[#allocation2] sm:$0xff] }
  0x13   :  { %26 = vst.msk [vmem:[#allocation5] sm:$0xff] %vm25_vm0, %v176_v0  ;;  %30 = vmatprep.subr.mxu0 %v28_v1  ;;  %94 = vmatprep.mubr.f32.mxu0 %v28_v1  ;;  %s177_s18 = smov [#allocation5]  }
  0x14   :  { %31 = vmatpush1.xpose.msra.mxu0 %v27_v2  ;;  %s115_s0 = sshll.u32 %s177_s18, 4  ;;  %s116_s0 = int_to_ptr.vmem [resolvable:$true] %s115_s0 }
  0x15   :  { %s149_s19 = scalar_lea.vmem %s116_s0, 128  ;;  %p154_p9 = scmp.lt.s32.totalorder %s116_s0, %s116_s0 }
  0x16   :  { %p150_p8 = scmp.ne.s32.totalorder %s116_s0, %s149_s19  ;;  %p155_p10 = scmp.lt.s32.totalorder %s149_s19, %s149_s19 }
  0x17   :  { %95 = vmatmul.mubr.f32.vlgmr.msra.gmra.mrb[0].mxu0 %v27_v2 }
  0x18   :  { %p156_p11 = por %p155_p10, %p154_p9 }
  0x1a   :  { %v29_v3 = vld [vmem:[#allocation5] sm:$0xff]  ;;  %p157_p12 = pnand %p156_p11, %p150_p8 }
  0xea   :  { %v96_v4 = vpop.f32.mrb[0].mxu0 }
  0xeb   :  { %v100_v5 = vadd.f32 %v96_v4, %v29_v3  ;;  %v98_v6 = vpop.f32.mrb[1].mxu0 }
  0xed   :  { %102 = vst.msk [vmem:[#allocation5] sm:$0xff] %vm25_vm0, %v100_v5 }
  0xf4   :  { %v106_v7 = vld [vmem:[#allocation5] sm:$0xff] }
  0xf5   :  { %v107_v8 = vmul.f32 0.00048828125, %v106_v7 }
  0xf7   :  { %108 = vst.msk [vmem:[#allocation5] sm:$0xff] %vm25_vm0, %v107_v8 }
  0xf8   :  { %160 = shalt.err (!%p157_p12)
}
  0xf9   :  { %s161_s22 = scalar_lea.hbm %s216_s1, 128 }
  0xfa   :  { %p162_p13 = scmp.ne.s32.totalorder %s216_s1, %s161_s22  ;;  %p165_p0 = scmp.lt.u32.totalorder %s161_s22, %s216_s1 }
  0xfc   :  { %p167_p1 = pnand %p165_p0, %p162_p13 }
  0xfe   :  { %170 = shalt.err (!%p167_p1)
}
  0xff   :  { %118 = dma.vmem_to_hbm [thread:$0]  %s116_s0, 128, %s216_s1, [#allocation4]  }
 0x100   :  { %173 = dma.done.wait [#allocation4], 128  }
 0x101   :  { %174 = vsyncadd [#allocation4], 4294967168 }
 0x102   :  { %122 = vsyncpa [#allocation3], 1 }
 0x103   :  { %123 = vsyncpa [#allocation4], 1 }

</bundles_post_ra>
